<compile_context>
chip_gen: v7x
topology: tpu7x:2x2x1
jax: 0.10.0
libtpu: 0.0.40
codegen_flags: <defaults>
</compile_context>

<pallas_src>
import math

import jax
import jax.numpy as jnp
from jax.experimental import pallas as pl
from jax.experimental.pallas import tpu as pltpu


def _round_up(a: int, b: int) -> int:
    return (a + b - 1) // b * b


def overlap_linear_kernel(x_ref, y_ref, w1_ref, b1_ref, w2g_ref, sc_ref, o_ref):
    D = x_ref.shape[-1]
    H = w1_ref.shape[-1]

    # dense(cat([x, y], -1)) == x @ W1[:D] + y @ W1[D:]   (f32 accumulation on the MXU;
    # the concatenation never materializes anywhere).
    h = (jnp.dot(x_ref[...], w1_ref[:D, :], preferred_element_type=jnp.float32)
         + jnp.dot(y_ref[...], w1_ref[D:, :], preferred_element_type=jnp.float32)
         + b1_ref[...])

    # gelu(x) = x * 0.5 * (1 + erf(x / sqrt(2)))   (exact erf form, as in the reference)
    h = h * 0.5 * (1.0 + jax.lax.erf(h * (1.0 / math.sqrt(2.0))))

    # Row statistics as lane-dense (1, tm) rows via the MXU (contract H of both
    # operands — same dimension numbers as the flash-attention q.k^T pattern).  This
    # replaces the whole [tm, H] LayerNorm/affine/decoder broadcast chain with three
    # skinny matmuls plus per-row scalar math, already in the output's lane-major layout.
    dims = (((1,), (1,)), ((), ()))
    ones_row = jnp.ones((1, H), jnp.float32)
    s1 = jax.lax.dot_general(ones_row, h, dims,
                             preferred_element_type=jnp.float32)        # (1, tm) sum(h)
    s2 = jax.lax.dot_general(ones_row, h * h, dims,
                             preferred_element_type=jnp.float32)        # (1, tm) sum(h^2)
    sw = jax.lax.dot_general(w2g_ref[...], h, dims,
                             preferred_element_type=jnp.float32)        # (1, tm) sum(h*w2')

    inv_h = 1.0 / H
    mu = s1 * inv_h
    var = s2 * inv_h - mu * mu          # one-pass (biased) variance, f32
    sum_w2g = sc_ref[0]                 # sum(gamma * w2)
    b2p = sc_ref[1]                     # b2 + dot(beta, w2)
    out = jax.lax.rsqrt(var + 1e-12) * (sw - mu * sum_w2g) + b2p
    o_ref[...] = out.astype(o_ref.dtype)


def overlap_linear(x, y, params, *, tm=512, matmul_dtype=None, out_dtype=jnp.float32,
                   single_buffer_weights=False, vmem_limit_bytes=None, interpret=False):
    """x, y: [..., input_size]  ->  [..., 1]  (float32 by default)."""
    w1, b1, gamma, beta, w2, b2 = (
        params["w1"], params["b1"], params["gamma"], params["beta"],
        params["w2"], params["b2"],
    )
    D = x.shape[-1]
    H = w1.shape[1]
    assert y.shape[-1] == D, (y.shape, D)
    assert w1.shape[0] == 2 * D, (w1.shape, D)
    lead = x.shape[:-1]
    N = math.prod(lead) if lead else 1

    # MXU operand dtype (pass jnp.bfloat16 on v5e, or when bf16 inputs are acceptable);
    # accumulation and all post-matmul math stay f32.
    mx_dtype = matmul_dtype if matmul_dtype is not None else x.dtype
    xf = x.reshape(N, D).astype(mx_dtype)
    yf = y.reshape(N, D).astype(mx_dtype)
    w1m = w1.astype(mx_dtype)                               # [2D, H], resident

    # Fold LayerNorm affine into the decoder (exact algebra):
    #   (gamma*hn + beta) @ w2 + b2 == hn @ (gamma*w2) + (b2 + beta @ w2)
    w2_vec = w2.reshape(-1).astype(jnp.float32)
    w2g = (gamma.astype(jnp.float32) * w2_vec).reshape(1, H)
    b1r = b1.reshape(1, H).astype(jnp.float32)
    sum_w2g = jnp.sum(w2g)
    b2p = b2.reshape(()).astype(jnp.float32) + jnp.dot(beta.astype(jnp.float32), w2_vec)
    scal = jnp.stack([sum_w2g, b2p])                        # (2,) f32, read from SMEM

    # Row tile.  Multi-step grids keep tm a multiple of 128 (lane-dense output-block
    # alignment) and guarantee >=2 steps once N >= 256 so the "parallel" axis spans both
    # v7x TensorCores.  No input padding: the ragged tail block reads OOB garbage rows
    # whose (row-independent) outputs are sliced off below.
    if N >= 256:
        tm = min(max(tm, 128), _round_up(pl.cdiv(N, 2), 128))
        tm = _round_up(tm, 128)
    else:
        tm = N                                              # single block == full extent
    grid = pl.cdiv(N, tm)
    n_pad = grid * tm

    cp_kwargs = dict(dimension_semantics=("parallel",))
    if vmem_limit_bytes is None:
        # Only raise the scoped VMEM limit when the working set approaches the default
        # (16 MiB on v5e, 32 MiB on v6e/v7x); cap at 64 MiB (v7x physical VMEM).
        in_bytes = jnp.dtype(mx_dtype).itemsize
        w_bufs = 1 if single_buffer_weights else 2
        est = (2 * 2 * tm * D * in_bytes                    # x, y tiles (double-buffered)
               + 2 * tm * 4                                 # (1, tm) f32 output
               + w_bufs * (2 * D * H * in_bytes + 2 * H * 4)
               + 3 * tm * H * 4)                            # h, h*h f32 temporaries + slack
        if est > 12 * 1024 * 1024:
            vmem_limit_bytes = min(2 * est, 64 * 1024 * 1024)
    if vmem_limit_bytes is not None:
        cp_kwargs["vmem_limit_bytes"] = int(vmem_limit_bytes)

    def resident(shape):
        # Grid-invariant blocks.  At production D/H on v7x (64 MiB VMEM) enable
        # single_buffer_weights to halve their footprint (block index is constant, so a
        # second pipeline buffer buys nothing).
        if single_buffer_weights:
            return pl.BlockSpec(shape, lambda i: (0, 0), pipeline_mode=pl.Buffered(1))
        return pl.BlockSpec(shape, lambda i: (0, 0))

    out2d = pl.pallas_call(
        overlap_linear_kernel,
        out_shape=jax.ShapeDtypeStruct((1, n_pad), out_dtype),
        grid_spec=pltpu.PrefetchScalarGridSpec(
            num_scalar_prefetch=0,
            grid=(grid,),
            in_specs=[
                pl.BlockSpec((tm, D), lambda i: (i, 0)),            # x row tile
                pl.BlockSpec((tm, D), lambda i: (i, 0)),            # y row tile
                resident((2 * D, H)),                               # W1 (both halves)
                resident((1, H)),                                   # b1
                resident((1, H)),                                   # gamma * w2
                pl.BlockSpec(memory_space=pltpu.MemorySpace.SMEM),  # [sum(gamma*w2), b2']
            ],
            out_specs=pl.BlockSpec((1, tm), lambda i: (0, i)),      # lane-dense output row
        ),
        compiler_params=pltpu.CompilerParams(**cp_kwargs),
        interpret=interpret,
    )(xf, yf, w1m, b1r, w2g, scal)

    out = out2d.reshape(-1)[:N]
    return out.reshape(*lead, 1)


def make_params(key, input_size, hidden_size):
    k1, k2, k3, k4 = jax.random.split(key, 4)
    # deterministic synthetic init (not a checkpoint load)
    w1 = jax.random.normal(k1, (2 * input_size, hidden_size), jnp.float32) * 0.02
    b1 = jax.random.normal(k2, (hidden_size,), jnp.float32) * 0.02
    gamma = jnp.ones((hidden_size,), jnp.float32)
    beta = jnp.zeros((hidden_size,), jnp.float32)
    w2 = jax.random.normal(k3, (hidden_size, 1), jnp.float32) * 0.02
    b2 = jax.random.normal(k4, (1,), jnp.float32) * 0.02
    return {"w1": w1, "b1": b1, "gamma": gamma, "beta": beta, "w2": w2, "b2": b2}


def _reference(x, y, params):
    # pure-JAX reference (matches the PyTorch forward op-for-op)
    fuse = jnp.concatenate([x, y], axis=-1)
    h = fuse @ params["w1"] + params["b1"]
    h = h * 0.5 * (1.0 + jax.lax.erf(h / math.sqrt(2.0)))
    mu = jnp.mean(h, axis=-1, keepdims=True)
    var = jnp.mean((h - mu) ** 2, axis=-1, keepdims=True)
    hn = (h - mu) / jnp.sqrt(var + 1e-12)
    hn = params["gamma"] * hn + params["beta"]
    return hn @ params["w2"] + params["b2"]


if __name__ == "__main__":
    input_size = 64
    hidden_size = 128

    key = jax.random.PRNGKey(0)
    kx, ky, kp, kx2, ky2, kx3, ky3 = jax.random.split(key, 7)
    params = make_params(kp, input_size, hidden_size)

    # --- small f32 problem: N = 14 -> single ragged block (tm = N), grid = 1.
    x = jax.random.normal(kx, (2, 7, input_size), jnp.float32)
    y = jax.random.normal(ky, (2, 7, input_size), jnp.float32)
    out = jax.block_until_ready(overlap_linear(x, y, params))
    ref = _reference(x, y, params)
    assert out.shape == (2, 7, 1), out.shape
    assert jnp.allclose(out, ref, atol=2e-4, rtol=2e-4), "f32 (small) mismatch vs reference"

    # --- larger f32 problem: N = 385 -> tm = 256, grid = 2 with an OOB tail block.
    x3 = jax.random.normal(kx3, (5, 77, input_size), jnp.float32)
    y3 = jax.random.normal(ky3, (5, 77, input_size), jnp.float32)
    out3 = jax.block_until_ready(overlap_linear(x3, y3, params))
    ref3 = _reference(x3, y3, params)
    assert out3.shape == (5, 77, 1), out3.shape
    assert jnp.allclose(out3, ref3, atol=2e-4, rtol=2e-4), "f32 (tiled) mismatch vs reference"

    # --- bf16 MXU path (recommended default on v5e): f32 inputs, bf16 matmul, f32 output.
    x2 = jax.random.normal(kx2, (3, 96, input_size), jnp.float32)
    y2 = jax.random.normal(ky2, (3, 96, input_size), jnp.float32)
    ref2 = _reference(x2, y2, params)
    out2 = jax.block_until_ready(
        overlap_linear(x2, y2, params, matmul_dtype=jnp.bfloat16))
    assert out2.shape == (3, 96, 1), out2.shape
    assert bool(jnp.all(jnp.isfinite(out2)))
    assert jnp.allclose(out2, ref2, atol=5e-2, rtol=5e-2), "bf16 mismatch vs reference"

    print("KERNEL_OK")
</pallas_src>

<mosaic_0001>
module attributes {stable_mosaic.version = 11 : i64} {
  func.func @overlap_linear_kernel(%arg0: i32, %arg1: memref<14x64xf32, #tpu.memory_space<vmem>>, %arg2: memref<14x64xf32, #tpu.memory_space<vmem>>, %arg3: memref<128x128xf32, #tpu.memory_space<vmem>>, %arg4: memref<1x128xf32, #tpu.memory_space<vmem>>, %arg5: memref<1x128xf32, #tpu.memory_space<vmem>>, %arg6: memref<2xf32, #tpu.memory_space<smem>>, %arg7: memref<1x14xf32, #tpu.memory_space<vmem>>) attributes {dimension_semantics = [#tpu.dimension_semantics<parallel>], iteration_bounds = array<i64: 1>, scalar_prefetch = 0 : i64, scratch_operands = 0 : i64, tpu.core_type = #tpu.core_type<tc>, window_params = [{transform_indices = @transform_0, window_bounds = array<i64: 14, 64>}, {transform_indices = @transform_1, window_bounds = array<i64: 14, 64>}, {pipeline_mode = #tpu.pipeline_mode<synchronous>, transform_indices = @transform_2, window_bounds = array<i64: 128, 128>}, {pipeline_mode = #tpu.pipeline_mode<synchronous>, transform_indices = @transform_3, window_bounds = array<i64: 1, 128>}, {pipeline_mode = #tpu.pipeline_mode<synchronous>, transform_indices = @transform_4, window_bounds = array<i64: 1, 128>}, {transform_indices = @transform_5, window_bounds = array<i64: 2>}, {transform_indices = @transform_6, window_bounds = array<i64: 1, 14>}]} {
    %c0 = arith.constant 0 : index
    %c0_0 = arith.constant 0 : index
    %0 = vector.load %arg1[%c0, %c0_0] : memref<14x64xf32, #tpu.memory_space<vmem>>, vector<14x64xf32>
    %c0_1 = arith.constant 0 : index
    %c0_2 = arith.constant 0 : index
    %1 = vector.load %arg3[%c0_1, %c0_2] : memref<128x128xf32, #tpu.memory_space<vmem>>, vector<64x128xf32>
    %cst = arith.constant dense<0.000000e+00> : vector<14x128xf32>
    %2 = tpu.matmul %0, %1, %cst {dimension_numbers = #tpu.dot_dimension_numbers<[1], [0], [0], [1], [0, 0, 1, 1], [], []>} : vector<14x64xf32>, vector<64x128xf32>, vector<14x128xf32> -> vector<14x128xf32>
    %c0_3 = arith.constant 0 : index
    %c0_4 = arith.constant 0 : index
    %3 = vector.load %arg2[%c0_3, %c0_4] : memref<14x64xf32, #tpu.memory_space<vmem>>, vector<14x64xf32>
    %c64 = arith.constant 64 : index
    %c0_5 = arith.constant 0 : index
    %4 = vector.load %arg3[%c64, %c0_5] : memref<128x128xf32, #tpu.memory_space<vmem>>, vector<64x128xf32>
    %cst_6 = arith.constant dense<0.000000e+00> : vector<14x128xf32>
    %5 = tpu.matmul %3, %4, %cst_6 {dimension_numbers = #tpu.dot_dimension_numbers<[1], [0], [0], [1], [0, 0, 1, 1], [], []>} : vector<14x64xf32>, vector<64x128xf32>, vector<14x128xf32> -> vector<14x128xf32>
    %6 = arith.addf %2, %5 : vector<14x128xf32>
    %c0_7 = arith.constant 0 : index
    %c0_8 = arith.constant 0 : index
    %7 = vector.load %arg4[%c0_7, %c0_8] : memref<1x128xf32, #tpu.memory_space<vmem>>, vector<1x128xf32>
    %8 = vector.broadcast %7 : vector<1x128xf32> to vector<14x128xf32>
    %9 = arith.addf %6, %8 : vector<14x128xf32>
    %cst_9 = arith.constant 5.000000e-01 : f32
    %10 = vector.broadcast %cst_9 : f32 to vector<14x128xf32>
    %11 = arith.mulf %9, %10 : vector<14x128xf32>
    %cst_10 = arith.constant 0.707106769 : f32
    %12 = vector.broadcast %cst_10 : f32 to vector<14x128xf32>
    %13 = arith.mulf %9, %12 : vector<14x128xf32>
    %14 = math.erf %13 : vector<14x128xf32>
    %cst_11 = arith.constant 1.000000e+00 : f32
    %15 = vector.broadcast %cst_11 : f32 to vector<14x128xf32>
    %16 = arith.addf %15, %14 : vector<14x128xf32>
    %17 = arith.mulf %11, %16 : vector<14x128xf32>
    %cst_12 = arith.constant 1.000000e+00 : f32
    %18 = vector.broadcast %cst_12 : f32 to vector<1x128xf32>
    %cst_13 = arith.constant dense<0.000000e+00> : vector<1x14xf32>
    %19 = tpu.matmul %18, %17, %cst_13 {dimension_numbers = #tpu.dot_dimension_numbers<[1], [1], [0], [0], [0, 0, 1, 0], [], []>} : vector<1x128xf32>, vector<14x128xf32>, vector<1x14xf32> -> vector<1x14xf32>
    %20 = arith.mulf %17, %17 : vector<14x128xf32>
    %cst_14 = arith.constant dense<0.000000e+00> : vector<1x14xf32>
    %21 = tpu.matmul %18, %20, %cst_14 {dimension_numbers = #tpu.dot_dimension_numbers<[1], [1], [0], [0], [0, 0, 1, 0], [], []>} : vector<1x128xf32>, vector<14x128xf32>, vector<1x14xf32> -> vector<1x14xf32>
    %c0_15 = arith.constant 0 : index
    %c0_16 = arith.constant 0 : index
    %22 = vector.load %arg5[%c0_15, %c0_16] : memref<1x128xf32, #tpu.memory_space<vmem>>, vector<1x128xf32>
    %cst_17 = arith.constant dense<0.000000e+00> : vector<1x14xf32>
    %23 = tpu.matmul %22, %17, %cst_17 {dimension_numbers = #tpu.dot_dimension_numbers<[1], [1], [0], [0], [0, 0, 1, 0], [], []>} : vector<1x128xf32>, vector<14x128xf32>, vector<1x14xf32> -> vector<1x14xf32>
    %cst_18 = arith.constant 7.812500e-03 : f32
    %24 = vector.broadcast %cst_18 : f32 to vector<1x14xf32>
    %25 = arith.mulf %19, %24 : vector<1x14xf32>
    %cst_19 = arith.constant 7.812500e-03 : f32
    %26 = vector.broadcast %cst_19 : f32 to vector<1x14xf32>
    %27 = arith.mulf %21, %26 : vector<1x14xf32>
    %28 = arith.mulf %25, %25 : vector<1x14xf32>
    %29 = arith.subf %27, %28 : vector<1x14xf32>
    %c0_20 = arith.constant 0 : index
    %30 = memref.load %arg6[%c0_20] : memref<2xf32, #tpu.memory_space<smem>>
    %c1 = arith.constant 1 : index
    %31 = memref.load %arg6[%c1] : memref<2xf32, #tpu.memory_space<smem>>
    %cst_21 = arith.constant 9.99999996E-13 : f32
    %32 = vector.broadcast %cst_21 : f32 to vector<1x14xf32>
    %33 = arith.addf %29, %32 : vector<1x14xf32>
    %34 = math.rsqrt %33 : vector<1x14xf32>
    %35 = vector.broadcast %30 : f32 to vector<1x14xf32>
    %36 = arith.mulf %25, %35 : vector<1x14xf32>
    %37 = arith.subf %23, %36 : vector<1x14xf32>
    %38 = arith.mulf %34, %37 : vector<1x14xf32>
    %39 = vector.broadcast %31 : f32 to vector<1x14xf32>
    %40 = arith.addf %38, %39 : vector<1x14xf32>
    %c0_22 = arith.constant 0 : index
    %c0_23 = arith.constant 0 : index
    %41 = vector.load %arg7[%c0_22, %c0_23] : memref<1x14xf32, #tpu.memory_space<vmem>>, vector<1x14xf32>
    tpu.vector_store %arg7[%c0_22, %c0_23], %40 {strides = array<i32>} : memref<1x14xf32, #tpu.memory_space<vmem>>, vector<1x14xf32>,
    return
  }
  func.func @transform_0(%arg0: i32) -> (i32, i32) {
    %c0_i32 = arith.constant 0 : i32
    %c0_i32_0 = arith.constant 0 : i32
    return %arg0, %c0_i32 : i32, i32
  }
  func.func @transform_1(%arg0: i32) -> (i32, i32) {
    %c0_i32 = arith.constant 0 : i32
    %c0_i32_0 = arith.constant 0 : i32
    return %arg0, %c0_i32 : i32, i32
  }
  func.func @transform_2(%arg0: i32) -> (i32, i32) {
    %c0_i32 = arith.constant 0 : i32
    %c0_i32_0 = arith.constant 0 : i32
    %c0_i32_1 = arith.constant 0 : i32
    return %c0_i32, %c0_i32_0 : i32, i32
  }
  func.func @transform_3(%arg0: i32) -> (i32, i32) {
    %c0_i32 = arith.constant 0 : i32
    %c0_i32_0 = arith.constant 0 : i32
    %c0_i32_1 = arith.constant 0 : i32
    return %c0_i32, %c0_i32_0 : i32, i32
  }
  func.func @transform_4(%arg0: i32) -> (i32, i32) {
    %c0_i32 = arith.constant 0 : i32
    %c0_i32_0 = arith.constant 0 : i32
    %c0_i32_1 = arith.constant 0 : i32
    return %c0_i32, %c0_i32_0 : i32, i32
  }
  func.func @transform_5(%arg0: i32) -> i32 {
    %c0_i32 = arith.constant 0 : i32
    %c0_i32_0 = arith.constant 0 : i32
    return %c0_i32 : i32
  }
  func.func @transform_6(%arg0: i32) -> (i32, i32) {
    %c0_i32 = arith.constant 0 : i32
    %c0_i32_0 = arith.constant 0 : i32
    return %c0_i32, %arg0 : i32, i32
  }
}

</mosaic_0001>

<bundles_post_ra>
// kernel: tpu_custom_call.1
= control target key start
LH: loop header
LB: loop body
LE: loop exit
PB: predicated region body
PF: predicated region fallthrough
CT: control target
= control target key end

     0   :  { %11 = vsyncpa [#allocation3], 0  ;;  %s914_s0 = inlined_call_operand.hbm [shape: f32[14,64], index: 0, kind: input, shape index: {}]   ;;  %s915_s1 = inlined_call_operand.hbm [shape: f32[14,64], index: 1, kind: input, shape index: {}]   ;;  %s916_s2 = inlined_call_operand.hbm [shape: f32[128,128], index: 2, kind: input, shape index: {}]   ;;  %s917_s3 = inlined_call_operand.vmem [shape: f32[1,128], index: 3, kind: input, shape index: {}]   ;;  %s918_s4 = inlined_call_operand.vmem [shape: f32[1,128], index: 4, kind: input, shape index: {}]   ;;  %s919_s5 = inlined_call_operand.vmem [shape: f32[2], index: 5, kind: input, shape index: {}]   ;;  %s920_s6 = inlined_call_operand.hbm [shape: f32[1,14], index: 6, kind: output, shape index: {}]  }
   0x1   :  { %12 = vsyncpa [#allocation7], 0 }
   0x2   :  { %13 = vsyncpa [#allocation5], 0 }
   0x3   :  { %14 = vsyncpa [#allocation4], 0  ;;  %s788_s21 = smov [#allocation6]   ;;  %s789_s23 = smov [#allocation2]  }
   0x4   :  { %s32_s22 = sshll.u32 %s788_s21, 4  ;;  %s20_s24 = sshll.u32 %s789_s23, 4  ;;  %s33_s22 = int_to_ptr.vmem [resolvable:$true] %s32_s22  ;;  %s834_s24 = int_to_ptr.vmem [resolvable:$true] %s20_s24 }
   0x5   :  { %s680_s27 = scalar_lea.hbm %s915_s1, 256 }
   0x6   :  { %p681_p0 = scmp.ne.s32.totalorder %s915_s1, %s680_s27  ;;  %p684_p1 = scmp.lt.u32.totalorder %s680_s27, %s915_s1 }
   0x8   :  { %p686_p2 = pnand %p684_p1, %p681_p0 }
   0xa   :  { %689 = shalt.err (!%p686_p2)
}
   0xb   :  { %s690_s8 = scalar_lea.vmem %s33_s22, 256  ;;  %p695_p4 = scmp.lt.s32.totalorder %s33_s22, %s33_s22 }
   0xc   :  { %p691_p3 = scmp.ne.s32.totalorder %s33_s22, %s690_s8  ;;  %p696_p5 = scmp.lt.s32.totalorder %s690_s8, %s690_s8 }
   0xe   :  { %p697_p6 = por %p696_p5, %p695_p4 }
  0x10   :  { %p698_p7 = pnand %p697_p6, %p691_p3 }
  0x12   :  { %701 = shalt.err (!%p698_p7)
}
  0x13   :  { %s790_s9 = smov 128   ;;  %s791_s10 = smov 8  }
  0x14   :  { %38 = dma.hbm_to_vmem [thread:$0]  %s915_s1, 256, %s33_s22, [#allocation7], %s790_s9, %s790_s9, %s791_s10  }
  0x15   :  { %s702_s15 = scalar_lea.hbm %s914_s0, 256 }
  0x16   :  { %p703_p8 = scmp.ne.s32.totalorder %s914_s0, %s702_s15  ;;  %p706_p9 = scmp.lt.u32.totalorder %s702_s15, %s914_s0 }
  0x18   :  { %p708_p10 = pnand %p706_p9, %p703_p8 }
  0x1a   :  { %711 = shalt.err (!%p708_p10)
}
  0x1b   :  { %s712_s20 = scalar_lea.vmem %s834_s24, 256  ;;  %p717_p12 = scmp.lt.s32.totalorder %s834_s24, %s834_s24 }
  0x1c   :  { %p713_p11 = scmp.ne.s32.totalorder %s834_s24, %s712_s20  ;;  %p718_p13 = scmp.lt.s32.totalorder %s712_s20, %s712_s20 }
  0x1e   :  { %p719_p0 = por %p718_p13, %p717_p12 }
  0x20   :  { %p720_p1 = pnand %p719_p0, %p713_p11 }
  0x22   :  { %723 = shalt.err (!%p720_p1)
}
  0x23   :  { %26 = dma.hbm_to_vmem [thread:$0]  %s914_s0, 256, %s834_s24, [#allocation3], %s790_s9, %s790_s9, %s791_s10  }
  0x24   :  { %s61_s25 = sshll.u32 %s919_s5, 4  ;;  %s792_s26 = smov [#allocation8]   ;;  %s62_s25 = int_to_ptr.vmem [resolvable:$true] %s61_s25 }
  0x25   :  { %s44_s27 = sshll.u32 %s792_s26, 4  ;;  %s724_s30 = scalar_lea.hbm %s916_s2, 2048  ;;  %s45_s27 = int_to_ptr.vmem [resolvable:$true] %s44_s27 }
  0x26   :  { %p725_p2 = scmp.ne.s32.totalorder %s916_s2, %s724_s30  ;;  %p728_p3 = scmp.lt.u32.totalorder %s724_s30, %s916_s2 }
  0x28   :  { %p730_p4 = pnand %p728_p3, %p725_p2 }
  0x2a   :  { %733 = shalt.err (!%p730_p4)
}
  0x2b   :  { %s734_s0 = scalar_lea.vmem %s45_s27, 2048  ;;  %p739_p6 = scmp.lt.s32.totalorder %s45_s27, %s45_s27 }
  0x2c   :  { %p735_p5 = scmp.ne.s32.totalorder %s45_s27, %s734_s0  ;;  %p740_p7 = scmp.lt.s32.totalorder %s734_s0, %s734_s0 }
  0x2e   :  { %p741_p8 = por %p740_p7, %p739_p6 }
  0x30   :  { %p742_p9 = pnand %p741_p8, %p735_p5 }
  0x32   :  { %745 = shalt.err (!%p742_p9)
}
  0x33   :  { %50 = dma.hbm_to_vmem [thread:$0]  %s916_s2, 2048, %s45_s27, [#allocation7], %s790_s9, %s790_s9, %s791_s10  }
  0x34   :  { %s746_s13 = scalar_lea.vmem %s62_s25, 16  ;;  %p751_p11 = scmp.lt.s32.totalorder %s62_s25, %s62_s25 }
  0x35   :  { %p747_p10 = scmp.ne.s32.totalorder %s62_s25, %s746_s13  ;;  %p752_p12 = scmp.lt.s32.totalorder %s746_s13, %s746_s13 }
  0x37   :  { %p753_p13 = por %p752_p12, %p751_p11 }
  0x39   :  { %p754_p0 = pnand %p753_p13, %p747_p10 }
  0x3b   :  { %757 = shalt.err (!%p754_p0)
}
  0x3c   :  { %s793_s14 = smov [#allocation9]  }
  0x3d   :  { %64 = dma.vmem_to_smem %s62_s25, 16, %s793_s14, [#allocation5]  }
  0x3e   :  { %780 = dma.done.wait [#allocation3], 256  }
  0x3f   :  { %781 = vsyncadd [#allocation3], 4294967040 }
  0x40   :  { %782 = dma.done.wait [#allocation7], 2304  }
  0x41   :  { %783 = vsyncadd [#allocation7], 4294964992 }
  0x42   :  { %784 = dma.done.wait [#allocation5], 16  }
  0x43   :  { %785 = vsyncadd [#allocation5], 4294967280 }
  0x44   :  { %77 = sfence }
  0x45   :  { %v90_v0 = vld [vmem:[#allocation8 + $0x40] sm:$0xff]  ;;  %v91_v1 = vld [vmem:[#allocation8 + $0x48] sm:$0xff]  ;;  %v92_v2 = vld [vmem:[#allocation8 + $0x50] sm:$0xff]  ;;  %vm98_vm0 = vcmask 523264   ;;  %v794_v28 = vmov 0.0|0.0   ;;  %vm795_vm1 = vmmov 0  }
  0x46   :  { %v620_v3 = vpack.c.bf16 %v91_v1, %v90_v0  ;;  %v93_v4 = vld [vmem:[#allocation8 + $0x58] sm:$0xff]  ;;  %v94_v6 = vld [vmem:[#allocation8 + $0x60] sm:$0xff]  ;;  %v95_v7 = vld [vmem:[#allocation8 + $0x68] sm:$0xff]  ;;  %652 = vmatprep.subr.bf16.mxu1 %v794_v28  ;;  %v796_v29 = vmov 0.0   ;;  %v797_v49 = vmov 1.0   ;;  %s497_s15 = sld [smem:[#allocation9]] }
  0x47   :  { %v624_v5 = vpack.c.bf16 %v93_v4, %v92_v2  ;;  %v88_v8 = vld [vmem:[#allocation6] sm:$0xff]  ;;  %v628_v9 = vpack.c.bf16 %v95_v7, %v94_v6  ;;  %v97_v11 = vld [vmem:[#allocation8 + $0x78] sm:$0xff]  ;;  %v80_v13 = vld [vmem:[#allocation8] sm:$0xff]  ;;  %603 = vmatprep.mubr.msk.f32.mxu1 %vm795_vm1, %v796_v29  ;;  %s531_s16 = sld [smem:[#allocation9 + $0x1]]  ;;  %vm507_vm2 = vcmask 106496  }
  0x48   :  { %621 = vmatprep.subr.bf16.mxu0 %v620_v3  ;;  %577 = vmatprep.mubr.msk.f32.mxu0 %vm98_vm0, %v88_v8  ;;  %v96_v10 = vld [vmem:[#allocation8 + $0x70] sm:$0xff]  ;;  %v81_v14 = vld [vmem:[#allocation8 + $0x8] sm:$0xff]  ;;  %v83_v17 = vld [vmem:[#allocation8 + $0x18] sm:$0xff] }
  0x49   :  { %623 = vmatpush3.bf16.msra.mxu0 %v620_v3  ;;  %v632_v12 = vpack.c.bf16 %v97_v11, %v96_v10  ;;  %v636_v15 = vpack.c.bf16 %v81_v14, %v80_v13  ;;  %v82_v16 = vld [vmem:[#allocation8 + $0x10] sm:$0xff]  ;;  %v89_v18 = vld [vmem:[#allocation6 + $0x8] sm:$0x3f]  ;;  %v78_v20 = vld [vmem:[#allocation2] sm:$0xff] }
  0x4a   :  { %625 = vmatprep.subr.bf16.mxu0 %v624_v5  ;;  %v640_v19 = vpack.c.bf16 %v83_v17, %v82_v16  ;;  %v84_v21 = vld [vmem:[#allocation8 + $0x20] sm:$0xff]  ;;  %v85_v22 = vld [vmem:[#allocation8 + $0x28] sm:$0xff]  ;;  %v86_v24 = vld [vmem:[#allocation8 + $0x30] sm:$0xff] }
  0x4b   :  { %v644_v23 = vpack.c.bf16 %v85_v22, %v84_v21  ;;  %v87_v25 = vld [vmem:[#allocation8 + $0x38] sm:$0xff]  ;;  %v79_v27 = vld [vmem:[#allocation2 + $0x8] sm:$0x3f]  ;;  %v530_v30 = vld [vmem:[%s917_s3] ss:$0 sm:$0xff] }
  0x4c   :  { %v648_v26 = vpack.c.bf16 %v87_v25, %v86_v24  ;;  %v422_v50 = vld [vmem:[%s918_s4] sm:$0x1]  ;;  %v501_v59 = vstv %s497_s15  ;;  %s798_s4 = smov [#allocation10]  }
  0x4d   :  { %627 = vmatpush3.bf16.msra.mxu0 %v624_v5  ;;  %v505_v2 = vstv %s531_s16  ;;  %s515_s17 = sshll.u32 %s798_s4, 4  ;;  %s516_s17 = int_to_ptr.vmem [resolvable:$true] %s515_s17 }
  0x4e   :  { %629 = vmatprep.subr.bf16.mxu0 %v628_v9  ;;  %s758_s18 = scalar_lea.vmem %s516_s17, 16  ;;  %s762_s19 = scalar_lea.vmem %s516_s17, 32 }
  0x4f   :  { %p759_p1 = scmp.ne.s32.totalorder %s516_s17, %s758_s18  ;;  %p763_p2 = scmp.lt.s32.totalorder %s516_s17, %s516_s17 }
  0x50   :  { %p764_p3 = scmp.lt.s32.totalorder %s762_s19, %s758_s18 }
  0x51   :  { %631 = vmatpush3.bf16.msra.mxu0 %v628_v9 }
  0x52   :  { %633 = vmatprep.subr.bf16.mxu0 %v632_v12  ;;  %p765_p4 = por %p764_p3, %p763_p2 }
  0x54   :  { %p766_p5 = pnand %p765_p4, %p759_p1 }
  0x55   :  { %635 = vmatpush3.bf16.msra.mxu0 %v632_v12 }
  0x56   :  { %637 = vmatprep.subr.bf16.mxu0 %v636_v15 }
  0x58   :  { %578 = vmatmul.mubr.msk.f32.vlgmr.msra.gmra.mrb[0].mxu0 %vm98_vm0, %v89_v18 }
  0x59   :  { %639 = vmatpush3.bf16.msra.mxu0 %v636_v15  ;;  %596 = vmatprep.mubr.msk.f32.mxu0 %vm98_vm0, %v78_v20 }
  0x5a   :  { %641 = vmatprep.subr.bf16.mxu0 %v640_v19 }
  0x5d   :  { %643 = vmatpush3.bf16.msra.mxu0 %v640_v19 }
  0x5e   :  { %645 = vmatprep.subr.bf16.mxu0 %v644_v23 }
  0x61   :  { %647 = vmatpush3.bf16.msra.mxu0 %v644_v23 }
  0x62   :  { %649 = vmatprep.subr.bf16.mxu0 %v648_v26 }
  0x65   :  { %651 = vmatpush3.bf16.msra.mxu0 %v648_v26 }
  0x68   :  { %597 = vmatmul.mubr.msk.f32.vlgmr.msra.gmra.mrb[0].mxu0 %vm98_vm0, %v79_v27 }
 0x13b   :  { %v598_v31 = vpop.f32.mrb[0].mxu0 }
 0x13c   :  { %v269_v32 = vadd.f32 %v598_v31, %v530_v30  ;;  %v252_v33 = vpop.f32.mrb[1].mxu0 }
 0x13d   :  { %v268_v34 = vadd.f32 %v530_v30, %v252_v33 }
 0x13e   :  { %v273_v35 = vmul.f32 0.70710677, %v269_v32  ;;  %v271_v39 = vmul.f32 0.5, %v269_v32 }
 0x13f   :  { %v272_v36 = vmul.f32 0.70710677, %v268_v34  ;;  %v270_v41 = vmul.f32 0.5, %v268_v34 }
 0x140   :  { %674 = verf.f32 %v273_v35 }
 0x141   :  { %676 = verf.f32 %v272_v36 }
 0x14a   :  { %v675_v37 = vpop.eup %674 }
 0x14b   :  { %v677_v38 = vpop.eup %676  ;;  %v277_v40 = vadd.f32 1.0, %v675_v37 }
 0x14c   :  { %v276_v42 = vadd.f32 1.0, %v677_v38 }
 0x14d   :  { %v279_v43 = vmul.f32 %v277_v40, %v271_v39 }
 0x14e   :  { %v278_v44 = vmul.f32 %v276_v42, %v270_v41 }
 0x14f   :  { %v351_v45 = vmul.f32 %v279_v43, %v279_v43 }
 0x150   :  { %v653_v46 = vpack.c.bf16 %v279_v43, %v278_v44  ;;  %v350_v47 = vmul.f32 %v278_v44, %v278_v44 }
 0x152   :  { %654 = vmatpush3.bf16.xpose.msra.mxu1 %v653_v46  ;;  %v656_v48 = vpack.c.bf16 %v351_v45, %v350_v47 }
 0x153   :  { %655 = vmatprep.subr.bf16.mxu1 %v794_v28 }
 0x159   :  { %604 = vmatmul.mubr.f32.vlgmr.msra.gmra.mrb[0].mxu1 %v797_v49 }
 0x15a   :  { %657 = vmatpush3.bf16.xpose.msra.mxu1 %v656_v48  ;;  %610 = vmatprep.mubr.msk.f32.mxu1 %vm795_vm1, %v796_v29 }
 0x15b   :  { %658 = vmatprep.subr.bf16.mxu1 %v794_v28 }
 0x161   :  { %611 = vmatmul.mubr.f32.vlgmr.msra.gmra.mrb[2].mxu1 %v797_v49 }
 0x162   :  { %660 = vmatpush3.bf16.xpose.msra.mxu1 %v653_v46  ;;  %617 = vmatprep.mubr.msk.f32.mxu1 %vm795_vm1, %v796_v29 }
 0x169   :  { %618 = vmatmul.mubr.f32.vlgmr.msra.gmra.mrb[4].mxu1 %v422_v50 }
 0x22c   :  { %v346_v51 = vpop.f32.mrb[0].mxu1 }
 0x22d   :  { %v605_v52 = vpop.f32.mrb[1].mxu1  ;;  %v493_v53 = vmul.f32 0.0078125, %v346_v51 }
 0x22f   :  { %v495_v55 = vmul.f32 %v493_v53, %v493_v53  ;;  %v502_v61 = vmul.f32 %v501_v59, %v493_v53 }
 0x234   :  { %v418_v54 = vpop.f32.mrb[2].mxu1 }
 0x235   :  { %v494_v56 = vmul.f32 0.0078125, %v418_v54  ;;  %v612_v57 = vpop.f32.mrb[3].mxu1 }
 0x237   :  { %v496_v58 = vsub.f32 %v494_v56, %v495_v55 }
 0x239   :  { %v499_v60 = vadd.f32 1e-12, %v496_v58 }
 0x23b   :  { %678 = vrsqrt.f32 %v499_v60 }
 0x23c   :  { %v489_v62 = vpop.f32.mrb[4].mxu1 }
 0x23d   :  { %v503_v63 = vsub.f32 %v489_v62, %v502_v61  ;;  %v619_v0 = vpop.f32.mrb[5].mxu1 }
 0x245   :  { %v679_v1 = vpop.eup %678 }
 0x246   :  { %v504_v3 = vmul.f32 %v679_v1, %v503_v63 }
 0x248   :  { %v506_v4 = vadd.f32 %v505_v2, %v504_v3 }
 0x24a   :  { %508 = vst.msk [vmem:[#allocation10] sm:$0x1] %vm507_vm2, %v506_v4 }
 0x24b   :  { %769 = shalt.err (!%p766_p5)
}
 0x24c   :  { %s770_s21 = scalar_lea.hbm %s920_s6, 16 }
 0x24d   :  { %p771_p6 = scmp.ne.s32.totalorder %s920_s6, %s770_s21  ;;  %p774_p7 = scmp.lt.u32.totalorder %s770_s21, %s920_s6 }
 0x24f   :  { %p776_p8 = pnand %p774_p7, %p771_p6 }
 0x251   :  { %779 = shalt.err (!%p776_p8)
}
 0x252   :  { %518 = dma.vmem_to_hbm [thread:$0]  %s516_s17, 16, %s920_s6, [#allocation4]  }
 0x253   :  { %786 = dma.done.wait [#allocation4], 16  }
 0x254   :  { %787 = vsyncadd [#allocation4], 4294967280 }
 0x255   :  { %522 = vsyncpa [#allocation3], 1 }
 0x256   :  { %523 = vsyncpa [#allocation7], 1 }
 0x257   :  { %524 = vsyncpa [#allocation4], 1 }
 0x258   :  { %525 = vsyncpa [#allocation5], 1 }

</bundles_post_ra>
